<compile_context>
chip_gen: v6e
topology: v6e:2x2x1
jax: 0.10.0
libtpu: 0.0.40
codegen_flags: <defaults>
</compile_context>

<pallas_src>
import functools
import math

import jax
import jax.numpy as jnp
from jax.experimental import pallas as pl
from jax.experimental.pallas import tpu as pltpu

HEADS = 4          # gat_para1 in the PyTorch module
NEG_SLOPE = 0.2    # GATConv default LeakyReLU negative_slope
MASK_NEG = 1e30    # finite "minus infinity" (host reference only)


# ---------------------------------------------------------------------------
# Kernels
# ---------------------------------------------------------------------------
def _proj_kernel(wT_ref, xT_ref, asrc_ref, adst_ref,
                 xpT_ref, alsT_ref, aldT_ref):
    """Per-layer projection + per-head attention logits for one node tile.

      wT   : (H*C, Fin)  shared lin weight, transposed
      xT   : (Fin, T)    node features (node axis on lanes)
      asrc : (C, H)      att_src (head h in column h)
      adst : (C, H)      att_dst
    outputs
      xpT  : (H*C, T)    bf16 projected features (lane-dense)
      alsT : (H, T)      per-head source attention logits (f32)
      aldT : (H, T)      per-head destination attention logits (f32)
    """
    xpT = jnp.dot(wT_ref[...], xT_ref[...], preferred_element_type=jnp.float32)
    xpT_ref[...] = xpT.astype(xpT_ref.dtype)            # single bf16 cast+store

    asrc = asrc_ref[...]
    adst = adst_ref[...]
    c, n_heads = asrc.shape
    # VPU multiply + sublane-reduce per head (logits computed from f32 xpT).
    # TODO(synk): pad C to a multiple of 8 for general nclass so these
    # per-head slices never cross (8,128) tiles (C=8 here, already aligned).
    for h in range(n_heads):
        blk = xpT[h * c:(h + 1) * c, :]                               # (C, T)
        alsT_ref[h:h + 1, :] = jnp.sum(blk * asrc[:, h:h + 1],
                                       axis=0, keepdims=True)
        aldT_ref[h:h + 1, :] = jnp.sum(blk * adst[:, h:h + 1],
                                       axis=0, keepdims=True)


def _agg_kernel(seed_ref, amax_ref, maskT_ref, xpT_ref, asrc_ref, aldT_ref,
                b_ref, out_ref, acc_ref, ssum_ref, *,
                relu, dropout_p, training):
    """Masked attention + aggregation for one (dst tile, src tile) grid step.

      seed  : (1,)  int32 SMEM (dropout seed)
      amax  : (H,)  f32 SMEM, per-head global max of the source logits
      maskT : (TS, TN) bf16, maskT[src, dst] = 1 iff edge src->dst (0 padded)
      xpT   : (H*C, TS) bf16 projected features of this source tile
      asrc  : (TS, H) f32 per-head source logits (src axis on sublanes)
      aldT  : (H, TN) f32 per-head dest logits for this dst tile (lane-dense)
      b     : (H*C, 1) bias
      out   : (H*C, TN) lane-dense output tile, written on the last src step
      acc   : (H*C, TN) f32 scratch accumulator
      ssum  : (H, TN)  f32 scratch softmax denominators
    """
    j = pl.program_id(1)

    @pl.when(j == 0)
    def _init():
        acc_ref[...] = jnp.zeros(acc_ref.shape, jnp.float32)
        ssum_ref[...] = jnp.zeros(ssum_ref.shape, jnp.float32)

    maskf = maskT_ref[...].astype(jnp.float32)           # (TS, TN), shared
    xpT = xpT_ref[...]                                   # (HC, TS) bf16
    asrc = asrc_ref[...]                                 # (TS, H) f32
    aldT = aldT_ref[...]                                 # (H, TN) f32

    hc = xpT.shape[0]
    n_heads = asrc.shape[1]
    c = hc // n_heads

    for h in range(n_heads):
        adst_row = aldT[h:h + 1, :]                      # (1, TN)
        # Per-dst stabiliser: leaky is monotone, so
        #   leaky(max_s asrc + adst) >= max_s leaky(asrc + adst)
        # (exact per-row max over all sources) -> exp args <= 0, no overflow.
        m_row = amax_ref[h] + adst_row
        m_row = jnp.maximum(m_row, NEG_SLOPE * m_row)
        t = asrc[:, h:h + 1] + adst_row                  # (TS, TN)
        e = jnp.maximum(t, NEG_SLOPE * t)                # leaky ReLU, no select
        p = jnp.exp(e - m_row) * maskf                   # multiplicative mask
        ssum_ref[h:h + 1, :] += jnp.sum(p, axis=0, keepdims=True)
        # (C, TS) bf16 @ (TS, TN) bf16 -> (C, TN) f32, un-normalised weights.
        acc_ref[h * c:(h + 1) * c, :] += jnp.dot(
            xpT[h * c:(h + 1) * c, :], p.astype(jnp.bfloat16),
            preferred_element_type=jnp.float32)

    @pl.when(j == pl.num_programs(1) - 1)
    def _finalize():
        for h in range(n_heads):
            # deferred softmax normalisation on the small (C, TN) block
            inv = pl.reciprocal(ssum_ref[h:h + 1, :], approx=True)   # (1, TN)
            blk = (acc_ref[h * c:(h + 1) * c, :] * inv
                   + b_ref[h * c:(h + 1) * c, :])
            if relu:
                blk = jnp.maximum(blk, 0.0)
            if training and dropout_p > 0.0:
                # TODO(synk): TPU HW PRNG stream, not torch's RNG; masks are
                # not bit-identical to PyTorch dropout.
                pltpu.prng_seed(seed_ref[0], pl.program_id(0), h)
                bits = pltpu.prng_random_bits(blk.shape)
                bits = jnp.bitwise_and(bits,
                                       jnp.array(0x00FFFFFF, dtype=bits.dtype))
                u = bits.astype(jnp.float32) * (1.0 / (1 << 24))
                keep = u >= dropout_p
                blk = jnp.where(keep, blk * (1.0 / (1.0 - dropout_p)), 0.0)
            out_ref[h * c:(h + 1) * c, :] = blk.astype(out_ref.dtype)


# ---------------------------------------------------------------------------
# Wrapper
# ---------------------------------------------------------------------------
def _compiler_params(dims):
    kwargs = dict(dimension_semantics=dims)
    try:
        # Re-derived per chip generation (v5e/v6e 128 MiB, v7x 64 MiB).
        cap = pltpu.get_tpu_info().vmem_capacity_bytes
        kwargs["vmem_limit_bytes"] = min(int(cap * 3 // 4), 96 * 1024 * 1024)
    except Exception:
        pass
    return pltpu.CompilerParams(**kwargs)


def _choose_tiles(n):
    """(dst tile, src tile) — generation aware; single tile for small graphs."""
    if n <= 1024:
        return n, n
    try:
        vmem = pltpu.get_tpu_info().vmem_capacity_bytes
    except Exception:
        vmem = 128 * 1024 * 1024
    if vmem >= 100 * 1024 * 1024:      # v5e / v6e
        return 512, 1024
    # v7x: smaller scoped VMEM; keep (TS,TN) temporaries < ~few MB each.
    # (For megacore, n_pad/tile_n should ideally be even and >= 8.)
    return 256, 512


def prepare_graph(mask, tile_n, tile_s):
    """One-time (per graph) mask preprocessing, hoisted out of the forward
    path: transpose to mask^T[src, dst], downcast to bf16, and zero-pad N to
    the tile grid so the accumulating kernel never reads OOB source rows.
    (int8 mask is a further option for v5e's lower HBM bandwidth.)"""
    n = mask.shape[0]
    lcm = math.lcm(int(tile_n), int(tile_s))
    n_pad = ((n + lcm - 1) // lcm) * lcm
    maskT = mask.T.astype(jnp.bfloat16)
    if n_pad > n:
        maskT = jnp.pad(maskT, ((0, n_pad - n), (0, n_pad - n)))
    return maskT


def _gat_layer(xT, maskT, p, *, tile_n, tile_s, relu, dropout_p, training,
               seed):
    """One GATConv (concat=True) in transposed layout: xT (Fin,Np) -> (H*C,Np)."""
    hc, fin = p["wT"].shape
    c, n_heads = p["att_src"].shape
    n_pad = xT.shape[1]
    grid_n = n_pad // tile_n
    grid_s = n_pad // tile_s

    # --- projection (wT @ xT per node tile, plus per-head logits) ----------
    xpT, alsT, aldT = pl.pallas_call(
        _proj_kernel,
        grid=(grid_n,),
        in_specs=[
            pl.BlockSpec((hc, fin), lambda i: (0, 0)),          # wT
            pl.BlockSpec((fin, tile_n), lambda i: (0, i)),      # xT node tile
            pl.BlockSpec((c, n_heads), lambda i: (0, 0)),       # att_src
            pl.BlockSpec((c, n_heads), lambda i: (0, 0)),       # att_dst
        ],
        out_specs=(
            pl.BlockSpec((hc, tile_n), lambda i: (0, i)),       # xpT (bf16)
            pl.BlockSpec((n_heads, tile_n), lambda i: (0, i)),  # alpha_src^T
            pl.BlockSpec((n_heads, tile_n), lambda i: (0, i)),  # alpha_dst^T
        ),
        out_shape=(
            jax.ShapeDtypeStruct((hc, n_pad), jnp.bfloat16),
            jax.ShapeDtypeStruct((n_heads, n_pad), jnp.float32),
            jax.ShapeDtypeStruct((n_heads, n_pad), jnp.float32),
        ),
        compiler_params=_compiler_params(("parallel",)),
    )(p["wT"], xT, p["att_src"], p["att_dst"])

    # Tiny XLA ops on (H, N) arrays (4*N floats, not N^2): source logits with
    # the source axis on sublanes for the agg kernel, and the per-head global
    # max used as the softmax stabiliser (no running max across src tiles).
    asrc_nat = alsT.T                                    # (N_pad, H)
    asrc_max = jnp.max(alsT, axis=1)                     # (H,)

    # --- masked softmax + aggregation, accumulated over source tiles -------
    kernel = functools.partial(_agg_kernel, relu=relu,
                               dropout_p=float(dropout_p),
                               training=bool(training))
    outT = pl.pallas_call(
        kernel,
        grid=(grid_n, grid_s),
        in_specs=[
            pl.BlockSpec(memory_space=pltpu.MemorySpace.SMEM),     # seed
            pl.BlockSpec(memory_space=pltpu.MemorySpace.SMEM),     # asrc_max
            pl.BlockSpec((tile_s, tile_n), lambda i, j: (j, i)),   # mask^T tile
            pl.BlockSpec((hc, tile_s), lambda i, j: (0, j)),       # xpT src tile
            pl.BlockSpec((tile_s, n_heads), lambda i, j: (j, 0)),  # alpha_src
            pl.BlockSpec((n_heads, tile_n), lambda i, j: (0, i)),  # alpha_dst^T
            pl.BlockSpec((hc, 1), lambda i, j: (0, 0)),            # bias
        ],
        out_specs=pl.BlockSpec((hc, tile_n), lambda i, j: (0, i)),
        out_shape=jax.ShapeDtypeStruct((hc, n_pad), jnp.float32),
        scratch_shapes=[
            pltpu.VMEM((hc, tile_n), jnp.float32),       # acc
            pltpu.VMEM((n_heads, tile_n), jnp.float32),  # softmax denominators
        ],
        compiler_params=_compiler_params(("parallel", "arbitrary")),
    )(seed, asrc_max, maskT, xpT, asrc_nat, aldT, p["bias"])
    return outT


def stand_gat2_forward(x, maskT, params, *, dropout_p, training=False,
                       seed=0, tile_n=None, tile_s=None):
    """x (N, nfeat); maskT from prepare_graph() (bf16, transposed, padded)."""
    n = x.shape[0]
    n_pad = maskT.shape[0]
    if tile_n is None or tile_s is None:
        tile_n, tile_s = _choose_tiles(n_pad)
    if n_pad > n:
        x = jnp.pad(x, ((0, n_pad - n), (0, 0)))
    xT = x.T                                   # (Fin, N_pad), nodes on lanes

    seed1 = jnp.asarray([seed & 0x7FFFFFFF], jnp.int32)
    seed2 = jnp.asarray([(seed + 0x5BD1E995) & 0x7FFFFFFF], jnp.int32)

    # conv1 + ReLU (+ dropout when training) fused in the kernel epilogue
    h1T = _gat_layer(xT, maskT, params["conv1"], tile_n=tile_n, tile_s=tile_s,
                     relu=True, dropout_p=dropout_p, training=training,
                     seed=seed1)
    # conv2 (no activation, matches the PyTorch forward)
    outT = _gat_layer(h1T, maskT, params["conv2"], tile_n=tile_n,
                      tile_s=tile_s, relu=False, dropout_p=0.0,
                      training=False, seed=seed2)
    return outT.T[:n]                          # (N, H*nclass)


# ---------------------------------------------------------------------------
# Parameters & host reference
# ---------------------------------------------------------------------------
def init_params(key, nfeat, nhid, nclass, heads):
    ks = jax.random.split(key, 6)

    def glorot(k, shape):
        lim = (6.0 / (shape[0] + shape[1])) ** 0.5
        return jax.random.uniform(k, shape, jnp.float32, -lim, lim)

    def layer(kw, ksrc, kdst, fin):
        w = glorot(kw, (fin, heads * nclass))
        att_src = glorot(ksrc, (heads, nclass))
        att_dst = glorot(kdst, (heads, nclass))
        return {
            # kernel-side (transposed) copies
            "wT": w.T,                                       # (H*C, Fin)
            "att_src": att_src.T,                            # (C, H)
            "att_dst": att_dst.T,                            # (C, H)
            "bias": jnp.zeros((heads * nclass, 1), jnp.float32),
            # natural copies for the host reference
            "w": w, "a_src": att_src, "a_dst": att_dst,
        }

    return {"conv1": layer(ks[0], ks[1], ks[2], nfeat),
            "conv2": layer(ks[3], ks[4], ks[5], nhid)}


def _gat_layer_ref(x, mask, w, att_src, att_dst, bias):
    """Pure-jnp reference GATConv (same bf16-MXU dtype policy as the kernel)."""
    n = x.shape[0]
    h, c = att_src.shape
    xp = jnp.dot(x, w, preferred_element_type=jnp.float32)       # (N, H*C)
    a_s = jnp.einsum("nhc,hc->nh", xp.reshape(n, h, c), att_src)
    a_d = jnp.einsum("nhc,hc->nh", xp.reshape(n, h, c), att_dst)
    outs = []
    for hh in range(h):
        e = a_d[:, hh:hh + 1] + a_s[:, hh][None, :]              # (dst, src)
        e = jnp.maximum(e, NEG_SLOPE * e)
        e = e + (mask - 1.0) * MASK_NEG
        e = e - jnp.max(e, axis=1, keepdims=True)
        p = jnp.exp(e)
        attn = p / jnp.sum(p, axis=1, keepdims=True)
        outs.append(jnp.dot(attn.astype(jnp.bfloat16),
                            xp[:, hh * c:(hh + 1) * c].astype(jnp.bfloat16),
                            preferred_element_type=jnp.float32))
    return jnp.concatenate(outs, axis=-1) + bias.reshape(1, -1)


# ---------------------------------------------------------------------------
if __name__ == "__main__":
    N, nfeat, nclass = 32, 16, 8
    heads = HEADS
    nhid = heads * nclass   # conv2 input dim must equal conv1's concat output
    dropout = 0.5

    key = jax.random.PRNGKey(0)
    kx, ke, kp = jax.random.split(key, 3)

    x = jax.random.normal(kx, (N, nfeat), jnp.float32)

    # random edge_index (2, E) -> dense mask[dst, src] with self loops
    # (a dst row with no edges at all would divide by zero; self-loops, which
    #  GATConv adds by default, guarantee this never happens)
    E = 64
    src = jax.random.randint(ke, (E,), 0, N)
    dst = jax.random.randint(jax.random.fold_in(ke, 1), (E,), 0, N)
    mask = jnp.zeros((N, N), jnp.float32).at[dst, src].set(1.0)
    mask = jnp.maximum(mask, jnp.eye(N, dtype=jnp.float32))

    params = init_params(kp, nfeat, nhid, nclass, heads)

    # per-graph preprocessing, hoisted out of the forward path
    tile_n, tile_s = _choose_tiles(N)
    maskT = prepare_graph(mask, tile_n, tile_s)

    out = stand_gat2_forward(x, maskT, params, dropout_p=dropout,
                             training=False, tile_n=tile_n, tile_s=tile_s)
    out = jax.block_until_ready(out)

    # host-side reference (eval mode: dropout is identity)
    p1, p2 = params["conv1"], params["conv2"]
    x0 = jnp.maximum(
        _gat_layer_ref(x, mask, p1["w"], p1["a_src"], p1["a_dst"], p1["bias"]),
        0.0)
    ref = _gat_layer_ref(x0, mask, p2["w"], p2["a_src"], p2["a_dst"], p2["bias"])

    assert out.shape == (N, heads * nclass)
    assert jnp.allclose(out, ref, atol=2.5e-2, rtol=2.5e-2), \
        float(jnp.max(jnp.abs(out - ref)))
    print("KERNEL_OK")
</pallas_src>

<mosaic_0001>
module attributes {stable_mosaic.version = 11 : i64} {
  func.func @_proj_kernel(%arg0: i32, %arg1: memref<32x16xf32, #tpu.memory_space<vmem>>, %arg2: memref<16x32xf32, #tpu.memory_space<vmem>>, %arg3: memref<8x4xf32, #tpu.memory_space<vmem>>, %arg4: memref<8x4xf32, #tpu.memory_space<vmem>>, %arg5: memref<32x32xbf16, #tpu.memory_space<vmem>>, %arg6: memref<4x32xf32, #tpu.memory_space<vmem>>, %arg7: memref<4x32xf32, #tpu.memory_space<vmem>>) attributes {dimension_semantics = [#tpu.dimension_semantics<parallel>], iteration_bounds = array<i64: 1>, scalar_prefetch = 0 : i64, scratch_operands = 0 : i64, tpu.core_type = #tpu.core_type<tc>, window_params = [{pipeline_mode = #tpu.pipeline_mode<synchronous>, transform_indices = @transform_0, window_bounds = array<i64: 32, 16>}, {transform_indices = @transform_1, window_bounds = array<i64: 16, 32>}, {pipeline_mode = #tpu.pipeline_mode<synchronous>, transform_indices = @transform_2, window_bounds = array<i64: 8, 4>}, {pipeline_mode = #tpu.pipeline_mode<synchronous>, transform_indices = @transform_3, window_bounds = array<i64: 8, 4>}, {transform_indices = @transform_4, window_bounds = array<i64: 32, 32>}, {transform_indices = @transform_5, window_bounds = array<i64: 4, 32>}, {transform_indices = @transform_6, window_bounds = array<i64: 4, 32>}]} {
    %c0 = arith.constant 0 : index
    %c0_0 = arith.constant 0 : index
    %0 = vector.load %arg1[%c0, %c0_0] : memref<32x16xf32, #tpu.memory_space<vmem>>, vector<32x16xf32>
    %c0_1 = arith.constant 0 : index
    %c0_2 = arith.constant 0 : index
    %1 = vector.load %arg2[%c0_1, %c0_2] : memref<16x32xf32, #tpu.memory_space<vmem>>, vector<16x32xf32>
    %cst = arith.constant dense<0.000000e+00> : vector<32x32xf32>
    %2 = tpu.matmul %0, %1, %cst {dimension_numbers = #tpu.dot_dimension_numbers<[1], [0], [0], [1], [0, 0, 1, 1], [], []>} : vector<32x16xf32>, vector<16x32xf32>, vector<32x32xf32> -> vector<32x32xf32>
    %3 = arith.truncf %2 : vector<32x32xf32> to vector<32x32xbf16>
    %c0_3 = arith.constant 0 : index
    %c0_4 = arith.constant 0 : index
    %4 = vector.load %arg5[%c0_3, %c0_4] : memref<32x32xbf16, #tpu.memory_space<vmem>>, vector<32x32xbf16>
    tpu.vector_store %arg5[%c0_3, %c0_4], %3 {strides = array<i32>} : memref<32x32xbf16, #tpu.memory_space<vmem>>, vector<32x32xbf16>,
    %c0_5 = arith.constant 0 : index
    %c0_6 = arith.constant 0 : index
    %5 = vector.load %arg3[%c0_5, %c0_6] : memref<8x4xf32, #tpu.memory_space<vmem>>, vector<8x4xf32>
    %c0_7 = arith.constant 0 : index
    %c0_8 = arith.constant 0 : index
    %6 = vector.load %arg4[%c0_7, %c0_8] : memref<8x4xf32, #tpu.memory_space<vmem>>, vector<8x4xf32>
    %7 = vector.extract_strided_slice %2 {offsets = [0, 0], sizes = [8, 32], strides = [1, 1]} : vector<32x32xf32> to vector<8x32xf32>
    %8 = vector.extract_strided_slice %5 {offsets = [0, 0], sizes = [8, 1], strides = [1, 1]} : vector<8x4xf32> to vector<8x1xf32>
    %9 = vector.broadcast %8 : vector<8x1xf32> to vector<8x32xf32>
    %10 = arith.mulf %7, %9 : vector<8x32xf32>
    %cst_9 = arith.constant dense<0.000000e+00> : vector<32xf32>
    %11 = vector.multi_reduction <add>, %10, %cst_9 [0] : vector<8x32xf32> to vector<32xf32>
    %12 = vector.shape_cast %11 : vector<32xf32> to vector<1x32xf32>
    %c0_10 = arith.constant 0 : index
    %c0_11 = arith.constant 0 : index
    %13 = vector.load %arg6[%c0_10, %c0_11] : memref<4x32xf32, #tpu.memory_space<vmem>>, vector<1x32xf32>
    tpu.vector_store %arg6[%c0_10, %c0_11], %12 {strides = array<i32>} : memref<4x32xf32, #tpu.memory_space<vmem>>, vector<1x32xf32>,
    %14 = vector.extract_strided_slice %6 {offsets = [0, 0], sizes = [8, 1], strides = [1, 1]} : vector<8x4xf32> to vector<8x1xf32>
    %15 = vector.broadcast %14 : vector<8x1xf32> to vector<8x32xf32>
    %16 = arith.mulf %7, %15 : vector<8x32xf32>
    %cst_12 = arith.constant dense<0.000000e+00> : vector<32xf32>
    %17 = vector.multi_reduction <add>, %16, %cst_12 [0] : vector<8x32xf32> to vector<32xf32>
    %18 = vector.shape_cast %17 : vector<32xf32> to vector<1x32xf32>
    %c0_13 = arith.constant 0 : index
    %c0_14 = arith.constant 0 : index
    %19 = vector.load %arg7[%c0_13, %c0_14] : memref<4x32xf32, #tpu.memory_space<vmem>>, vector<1x32xf32>
    tpu.vector_store %arg7[%c0_13, %c0_14], %18 {strides = array<i32>} : memref<4x32xf32, #tpu.memory_space<vmem>>, vector<1x32xf32>,
    %20 = vector.extract_strided_slice %2 {offsets = [8, 0], sizes = [8, 32], strides = [1, 1]} : vector<32x32xf32> to vector<8x32xf32>
    %21 = vector.extract_strided_slice %5 {offsets = [0, 1], sizes = [8, 1], strides = [1, 1]} : vector<8x4xf32> to vector<8x1xf32>
    %22 = vector.broadcast %21 : vector<8x1xf32> to vector<8x32xf32>
    %23 = arith.mulf %20, %22 : vector<8x32xf32>
    %cst_15 = arith.constant dense<0.000000e+00> : vector<32xf32>
    %24 = vector.multi_reduction <add>, %23, %cst_15 [0] : vector<8x32xf32> to vector<32xf32>
    %25 = vector.shape_cast %24 : vector<32xf32> to vector<1x32xf32>
    %c1 = arith.constant 1 : index
    %c0_16 = arith.constant 0 : index
    %26 = vector.load %arg6[%c1, %c0_16] : memref<4x32xf32, #tpu.memory_space<vmem>>, vector<1x32xf32>
    tpu.vector_store %arg6[%c1, %c0_16], %25 {strides = array<i32>} : memref<4x32xf32, #tpu.memory_space<vmem>>, vector<1x32xf32>,
    %27 = vector.extract_strided_slice %6 {offsets = [0, 1], sizes = [8, 1], strides = [1, 1]} : vector<8x4xf32> to vector<8x1xf32>
    %28 = vector.broadcast %27 : vector<8x1xf32> to vector<8x32xf32>
    %29 = arith.mulf %20, %28 : vector<8x32xf32>
    %cst_17 = arith.constant dense<0.000000e+00> : vector<32xf32>
    %30 = vector.multi_reduction <add>, %29, %cst_17 [0] : vector<8x32xf32> to vector<32xf32>
    %31 = vector.shape_cast %30 : vector<32xf32> to vector<1x32xf32>
    %c1_18 = arith.constant 1 : index
    %c0_19 = arith.constant 0 : index
    %32 = vector.load %arg7[%c1_18, %c0_19] : memref<4x32xf32, #tpu.memory_space<vmem>>, vector<1x32xf32>
    tpu.vector_store %arg7[%c1_18, %c0_19], %31 {strides = array<i32>} : memref<4x32xf32, #tpu.memory_space<vmem>>, vector<1x32xf32>,
    %33 = vector.extract_strided_slice %2 {offsets = [16, 0], sizes = [8, 32], strides = [1, 1]} : vector<32x32xf32> to vector<8x32xf32>
    %34 = vector.extract_strided_slice %5 {offsets = [0, 2], sizes = [8, 1], strides = [1, 1]} : vector<8x4xf32> to vector<8x1xf32>
    %35 = vector.broadcast %34 : vector<8x1xf32> to vector<8x32xf32>
    %36 = arith.mulf %33, %35 : vector<8x32xf32>
    %cst_20 = arith.constant dense<0.000000e+00> : vector<32xf32>
    %37 = vector.multi_reduction <add>, %36, %cst_20 [0] : vector<8x32xf32> to vector<32xf32>
    %38 = vector.shape_cast %37 : vector<32xf32> to vector<1x32xf32>
    %c2 = arith.constant 2 : index
    %c0_21 = arith.constant 0 : index
    %39 = vector.load %arg6[%c2, %c0_21] : memref<4x32xf32, #tpu.memory_space<vmem>>, vector<1x32xf32>
    tpu.vector_store %arg6[%c2, %c0_21], %38 {strides = array<i32>} : memref<4x32xf32, #tpu.memory_space<vmem>>, vector<1x32xf32>,
    %40 = vector.extract_strided_slice %6 {offsets = [0, 2], sizes = [8, 1], strides = [1, 1]} : vector<8x4xf32> to vector<8x1xf32>
    %41 = vector.broadcast %40 : vector<8x1xf32> to vector<8x32xf32>
    %42 = arith.mulf %33, %41 : vector<8x32xf32>
    %cst_22 = arith.constant dense<0.000000e+00> : vector<32xf32>
    %43 = vector.multi_reduction <add>, %42, %cst_22 [0] : vector<8x32xf32> to vector<32xf32>
    %44 = vector.shape_cast %43 : vector<32xf32> to vector<1x32xf32>
    %c2_23 = arith.constant 2 : index
    %c0_24 = arith.constant 0 : index
    %45 = vector.load %arg7[%c2_23, %c0_24] : memref<4x32xf32, #tpu.memory_space<vmem>>, vector<1x32xf32>
    tpu.vector_store %arg7[%c2_23, %c0_24], %44 {strides = array<i32>} : memref<4x32xf32, #tpu.memory_space<vmem>>, vector<1x32xf32>,
    %46 = vector.extract_strided_slice %2 {offsets = [24, 0], sizes = [8, 32], strides = [1, 1]} : vector<32x32xf32> to vector<8x32xf32>
    %47 = vector.extract_strided_slice %5 {offsets = [0, 3], sizes = [8, 1], strides = [1, 1]} : vector<8x4xf32> to vector<8x1xf32>
    %48 = vector.broadcast %47 : vector<8x1xf32> to vector<8x32xf32>
    %49 = arith.mulf %46, %48 : vector<8x32xf32>
    %cst_25 = arith.constant dense<0.000000e+00> : vector<32xf32>
    %50 = vector.multi_reduction <add>, %49, %cst_25 [0] : vector<8x32xf32> to vector<32xf32>
    %51 = vector.shape_cast %50 : vector<32xf32> to vector<1x32xf32>
    %c3 = arith.constant 3 : index
    %c0_26 = arith.constant 0 : index
    %52 = vector.load %arg6[%c3, %c0_26] : memref<4x32xf32, #tpu.memory_space<vmem>>, vector<1x32xf32>
    tpu.vector_store %arg6[%c3, %c0_26], %51 {strides = array<i32>} : memref<4x32xf32, #tpu.memory_space<vmem>>, vector<1x32xf32>,
    %53 = vector.extract_strided_slice %6 {offsets = [0, 3], sizes = [8, 1], strides = [1, 1]} : vector<8x4xf32> to vector<8x1xf32>
    %54 = vector.broadcast %53 : vector<8x1xf32> to vector<8x32xf32>
    %55 = arith.mulf %46, %54 : vector<8x32xf32>
    %cst_27 = arith.constant dense<0.000000e+00> : vector<32xf32>
    %56 = vector.multi_reduction <add>, %55, %cst_27 [0] : vector<8x32xf32> to vector<32xf32>
    %57 = vector.shape_cast %56 : vector<32xf32> to vector<1x32xf32>
    %c3_28 = arith.constant 3 : index
    %c0_29 = arith.constant 0 : index
    %58 = vector.load %arg7[%c3_28, %c0_29] : memref<4x32xf32, #tpu.memory_space<vmem>>, vector<1x32xf32>
    tpu.vector_store %arg7[%c3_28, %c0_29], %57 {strides = array<i32>} : memref<4x32xf32, #tpu.memory_space<vmem>>, vector<1x32xf32>,
    return
  }
  func.func @transform_0(%arg0: i32) -> (i32, i32) {
    %c0_i32 = arith.constant 0 : i32
    %c0_i32_0 = arith.constant 0 : i32
    %c0_i32_1 = arith.constant 0 : i32
    return %c0_i32, %c0_i32_0 : i32, i32
  }
  func.func @transform_1(%arg0: i32) -> (i32, i32) {
    %c0_i32 = arith.constant 0 : i32
    %c0_i32_0 = arith.constant 0 : i32
    return %c0_i32, %arg0 : i32, i32
  }
  func.func @transform_2(%arg0: i32) -> (i32, i32) {
    %c0_i32 = arith.constant 0 : i32
    %c0_i32_0 = arith.constant 0 : i32
    %c0_i32_1 = arith.constant 0 : i32
    return %c0_i32, %c0_i32_0 : i32, i32
  }
  func.func @transform_3(%arg0: i32) -> (i32, i32) {
    %c0_i32 = arith.constant 0 : i32
    %c0_i32_0 = arith.constant 0 : i32
    %c0_i32_1 = arith.constant 0 : i32
    return %c0_i32, %c0_i32_0 : i32, i32
  }
  func.func @transform_4(%arg0: i32) -> (i32, i32) {
    %c0_i32 = arith.constant 0 : i32
    %c0_i32_0 = arith.constant 0 : i32
    return %c0_i32, %arg0 : i32, i32
  }
  func.func @transform_5(%arg0: i32) -> (i32, i32) {
    %c0_i32 = arith.constant 0 : i32
    %c0_i32_0 = arith.constant 0 : i32
    return %c0_i32, %arg0 : i32, i32
  }
  func.func @transform_6(%arg0: i32) -> (i32, i32) {
    %c0_i32 = arith.constant 0 : i32
    %c0_i32_0 = arith.constant 0 : i32
    return %c0_i32, %arg0 : i32, i32
  }
}

</mosaic_0001>

<bundles_post_ra>
// kernel: tpu_custom_call.1
= control target key start
LH: loop header
LB: loop body
LE: loop exit
PB: predicated region body
PF: predicated region fallthrough
CT: control target
= control target key end

     0   :  { %12 = vsyncpa [#allocation3], 0  ;;  %vm28_vm0 = vcmask 130048   ;;  %s516_s0 = inlined_call_operand.vmem [shape: f32[32,16], index: 0, kind: input, shape index: {}]   ;;  %s517_s1 = inlined_call_operand.vmem [shape: f32[16,32], index: 1, kind: input, shape index: {}]   ;;  %s518_s2 = inlined_call_operand.vmem [shape: f32[8,4], index: 2, kind: input, shape index: {}]   ;;  %s519_s3 = inlined_call_operand.vmem [shape: f32[8,4], index: 3, kind: input, shape index: {}]   ;;  %s520_s4 = inlined_call_operand.hbm [shape: bf16[32,32], index: 4, kind: output, shape index: {0}]   ;;  %s521_s5 = inlined_call_operand.hbm [shape: f32[4,32], index: 5, kind: output, shape index: {1}]   ;;  %s522_s6 = inlined_call_operand.hbm [shape: f32[4,32], index: 6, kind: output, shape index: {2}]  }
   0x1   :  { %v27_v0 = vld [vmem:[%s517_s1 + $0x8] sm:$0xff]  ;;  %v26_v1 = vld [vmem:[%s517_s1] sm:$0xff]  ;;  %v24_v3 = vld [vmem:[%s516_s0 + $0x10] sm:$0xff] }
   0x2   :  { %318 = vmatprep.subr.mxu0 %v27_v0  ;;  %328 = vmatprep.subr.mxu1 %v27_v0  ;;  %v22_v2 = vld [vmem:[%s516_s0] sm:$0xff] }
   0x3   :  { %319 = vmatpush3.msra.mxu0 %v27_v0  ;;  %330 = vmatpush3.msra.mxu1 %v27_v0 }
   0x4   :  { %13 = vsyncpa [#allocation5], 0  ;;  %320 = vmatprep.subr.mxu0 %v26_v1  ;;  %329 = vmatprep.subr.mxu1 %v26_v1  ;;  %v23_v4 = vld [vmem:[%s516_s0 + $0x8] sm:$0xff]  ;;  %v25_v5 = vld [vmem:[%s516_s0 + $0x18] sm:$0xff]  ;;  %v412_v7 = vmov 0   ;;  %v413_v8 = vmov 2  }
   0x5   :  { %321 = vmatpush3.msra.mxu0 %v26_v1  ;;  %331 = vmatpush3.msra.mxu1 %v26_v1  ;;  %v147_v6 = vld [vmem:[%s518_s2] sm:$0xff]  ;;  %v414_v9 = vmov 1   ;;  %v415_v10 = vmov 3   ;;  %vm142_vm1 = vcmask 257024   ;;  %vm155_vm2 = vcmask 261120   ;;  %s416_s2 = smov [#allocation2]  }
   0x6   :  { %322 = vmatprep.mubr.msk.f32.mxu0 %vm28_vm0, %v22_v2  ;;  %325 = vmatprep.mubr.msk.f32.mxu1 %vm28_vm0, %v24_v3  ;;  %v148_v11 = vld [vmem:[%s519_s3] sm:$0xff]  ;;  %s262_s3 = sshll.u32 %s416_s2, 4  ;;  %vm163_vm3 = vcmask 253952   ;;  %s488_s3 = int_to_ptr.vmem [resolvable:$true] %s262_s3 }
   0x7   :  { %323 = vmatmul.mubr.msk.f32.vlgmr.msra.gmra.mxu0 %vm28_vm0, %v23_v4  ;;  %326 = vmatmul.mubr.msk.f32.vlgmr.msra.gmra.mxu1 %vm28_vm0, %v25_v5  ;;  %s348_s11 = scalar_lea.vmem %s488_s3, 256  ;;  %p353_p1 = scmp.lt.s32.totalorder %s488_s3, %s488_s3 }
   0x8   :  { %341 = vset.pattern.permute.xlu0 %v412_v7  ;;  %343 = vset.pattern.permute.xlu1 %v413_v8  ;;  %p349_p0 = scmp.ne.s32.totalorder %s488_s3, %s348_s11  ;;  %p354_p2 = scmp.lt.s32.totalorder %s348_s11, %s348_s11 }
   0x9   :  { %151 = vperm.xlu0 %341, %v147_v6   ;;  %206 = vperm.xlu1 %343, %v147_v6  }
   0xa   :  { %p355_p3 = por %p354_p2, %p353_p1 }
   0xc   :  { %p356_p4 = pnand %p355_p3, %p349_p0 }
   0xd   :  { %342 = vset.pattern.permute.xlu0 %v414_v9  ;;  %344 = vset.pattern.permute.xlu1 %v415_v10 }
   0xe   :  { %180 = vperm.xlu0 %342, %v147_v6   ;;  %232 = vperm.xlu1 %344, %v147_v6  }
  0x12   :  { %193 = vperm.xlu0 %342, %v148_v11   ;;  %345 = vset.pattern.permute.xlu1 %v412_v7 }
  0x13   :  { %167 = vperm.xlu1 %345, %v148_v11  }
  0x16   :  { %347 = vset.pattern.permute.xlu0 %v415_v10 }
  0x17   :  { %245 = vperm.xlu0 %347, %v148_v11   ;;  %346 = vset.pattern.permute.xlu1 %v413_v8 }
  0x18   :  { %219 = vperm.xlu1 %346, %v148_v11  }
  0x84   :  { %v152_v12 = vpop.permute.xlu0 %151  ;;  %v207_v13 = vpop.permute.xlu1 %206 }
  0x89   :  { %v181_v14 = vpop.permute.xlu0 %180  ;;  %v233_v15 = vpop.permute.xlu1 %232 }
  0x8d   :  { %v194_v16 = vpop.permute.xlu0 %193 }
  0x8e   :  { %v168_v17 = vpop.permute.xlu1 %167 }
  0x92   :  { %v246_v18 = vpop.permute.xlu0 %245 }
  0x93   :  { %v220_v43 = vpop.permute.xlu1 %219 }
  0xc7   :  { %v324_v19 = vpop.f32.mrf.mxu0  ;;  %v327_v20 = vpop.f32.mrf.mxu1 }
  0xc8   :  { %v309_v21 = vpack.c.bf16 %v324_v19, %v324_v19  ;;  %v183_v22 = vmul.f32 %v324_v19, %v181_v14  ;;  %v196_v23 = vmul.f32 %v324_v19, %v194_v16  ;;  %v311_v24 = vpack.c.bf16 %v327_v20, %v327_v20 }
  0xc9   :  { %v235_v25 = vmul.f32 %v327_v20, %v233_v15  ;;  %v248_v26 = vmul.f32 %v327_v20, %v246_v18  ;;  %v107_v27 = vpop.f32.mrf.mxu0  ;;  %v117_v32 = vpop.f32.mrf.mxu1 }
  0xca   :  { %144 = vst.msk [vmem:[#allocation2 + $0x4] sm:$0xf] %vm142_vm1, %v309_v21  ;;  %v184_v28 = vsel %vm155_vm2, %v183_v22, 0.0  ;;  %v197_v29 = vsel %vm155_vm2, %v196_v23, 0.0  ;;  %146 = vst.msk [vmem:[#allocation2 + $0xc] sm:$0xf] %vm142_vm1, %v311_v24  ;;  %v308_v30 = vpack.c.bf16 %v107_v27, %v107_v27  ;;  %v154_v31 = vmul.f32 %v152_v12, %v107_v27 }
  0xcb   :  { %v185_v33 = vrot.slane %v184_v28, 4  ;;  %v198_v34 = vrot.slane %v197_v29, 4  ;;  %v236_v35 = vsel %vm155_vm2, %v235_v25, 0.0  ;;  %v249_v36 = vsel %vm155_vm2, %v248_v26, 0.0 }
  0xcc   :  { %v237_v37 = vrot.slane %v236_v35, 4  ;;  %v250_v38 = vrot.slane %v249_v36, 4  ;;  %143 = vst.msk [vmem:[#allocation2] sm:$0xf] %vm142_vm1, %v308_v30  ;;  %v156_v39 = vsel %vm155_vm2, %v154_v31, 0.0  ;;  %v170_v40 = vmul.f32 %v168_v17, %v107_v27 }
  0xcd   :  { %v186_v41 = vadd.f32 %v185_v33, %v184_v28  ;;  %v199_v42 = vadd.f32 %v198_v34, %v197_v29  ;;  %v157_v44 = vrot.slane %v156_v39, 4  ;;  %v310_v45 = vpack.c.bf16 %v117_v32, %v117_v32 }
  0xce   :  { %v238_v46 = vadd.f32 %v237_v37, %v236_v35  ;;  %v251_v47 = vadd.f32 %v250_v38, %v249_v36  ;;  %v171_v48 = vsel %vm155_vm2, %v170_v40, 0.0  ;;  %v209_v49 = vmul.f32 %v207_v13, %v117_v32 }
  0xcf   :  { %v187_v50 = vrot.slane %v186_v41, 2  ;;  %v200_v51 = vrot.slane %v199_v42, 2  ;;  %v158_v52 = vadd.f32 %v157_v44, %v156_v39  ;;  %v172_v53 = vrot.slane %v171_v48, 4  ;;  %145 = vst.msk [vmem:[#allocation2 + $0x8] sm:$0xf] %vm142_vm1, %v310_v45 }
  0xd0   :  { %v239_v54 = vrot.slane %v238_v46, 2  ;;  %v252_v55 = vrot.slane %v251_v47, 2  ;;  %v210_v56 = vsel %vm155_vm2, %v209_v49, 0.0  ;;  %v222_v57 = vmul.f32 %v220_v43, %v117_v32 }
  0xd1   :  { %359 = shalt.err (!%p356_p4)
}
  0xd2   :  { %s417_s12 = smov 64   ;;  %s418_s13 = smov 4   ;;  %v188_v58 = vadd.f32 %v187_v50, %v186_v41  ;;  %v201_v59 = vadd.f32 %v200_v51, %v199_v42  ;;  %v159_v60 = vrot.slane %v158_v52, 2  ;;  %v173_v61 = vadd.f32 %v172_v53, %v171_v48 }
  0xd3   :  { %268 = dma.vmem_to_hbm [thread:$0]  %s488_s3, 256, %s520_s4, [#allocation3], %s417_s12, %s417_s12, %s418_s13   ;;  %v240_v62 = vadd.f32 %v239_v54, %v238_v46  ;;  %v253_v63 = vadd.f32 %v252_v55, %v251_v47  ;;  %v211_v0 = vrot.slane %v210_v56, 4  ;;  %v223_v1 = vsel %vm155_vm2, %v222_v57, 0.0 }
  0xd4   :  { %v189_v2 = vrot.slane %v188_v58, 1  ;;  %v202_v3 = vrot.slane %v201_v59, 1  ;;  %v160_v4 = vadd.f32 %v159_v60, %v158_v52  ;;  %v174_v5 = vrot.slane %v173_v61, 2  ;;  %s419_s4 = smov [#allocation4]   ;;  %s420_s17 = smov [#allocation6]  }
  0xd5   :  { %v241_v6 = vrot.slane %v240_v62, 1  ;;  %v254_v7 = vrot.slane %v253_v63, 1  ;;  %v212_v8 = vadd.f32 %v211_v0, %v210_v56  ;;  %v224_v9 = vrot.slane %v223_v1, 4  ;;  %s275_s16 = sshll.u32 %s419_s4, 4  ;;  %s285_s18 = sshll.u32 %s420_s17, 4  ;;  %s276_s16 = int_to_ptr.vmem [resolvable:$true] %s275_s16  ;;  %s286_s18 = int_to_ptr.vmem [resolvable:$true] %s285_s18 }
  0xd6   :  { %v161_v10 = vrot.slane %v160_v4, 1  ;;  %v175_v11 = vadd.f32 %v174_v5, %v173_v61  ;;  %v190_v12 = vadd.f32 %v189_v2, %v188_v58  ;;  %v203_v13 = vadd.f32 %v202_v3, %v201_v59  ;;  %s368_s19 = scalar_lea.vmem %s276_s16, 64  ;;  %p373_p6 = scmp.lt.s32.totalorder %s276_s16, %s276_s16 }
  0xd7   :  { %v213_v14 = vrot.slane %v212_v8, 2  ;;  %v225_v15 = vadd.f32 %v224_v9, %v223_v1  ;;  %v242_v16 = vadd.f32 %v241_v6, %v240_v62  ;;  %v255_v17 = vadd.f32 %v254_v7, %v253_v63  ;;  %p369_p5 = scmp.ne.s32.totalorder %s276_s16, %s368_s19  ;;  %p374_p7 = scmp.lt.s32.totalorder %s368_s19, %s368_s19 }
  0xd8   :  { %v162_v18 = vadd.f32 %v161_v10, %v160_v4  ;;  %v176_v19 = vrot.slane %v175_v11, 1  ;;  %191 = vst.msk [vmem:[#allocation4 + $0x1] sm:$0x1] %vm163_vm3, %v190_v12  ;;  %204 = vst.msk [vmem:[#allocation6 + $0x1] sm:$0x1] %vm163_vm3, %v203_v13 }
  0xd9   :  { %v214_v20 = vadd.f32 %v213_v14, %v212_v8  ;;  %v226_v21 = vrot.slane %v225_v15, 2  ;;  %243 = vst.msk [vmem:[#allocation4 + $0x3] sm:$0x1] %vm163_vm3, %v242_v16  ;;  %256 = vst.msk [vmem:[#allocation6 + $0x3] sm:$0x1] %vm163_vm3, %v255_v17  ;;  %p375_p8 = por %p374_p7, %p373_p6 }
  0xda   :  { %v177_v22 = vadd.f32 %v176_v19, %v175_v11  ;;  %164 = vst.msk [vmem:[#allocation4] sm:$0x1] %vm163_vm3, %v162_v18 }
  0xdb   :  { %v215_v23 = vrot.slane %v214_v20, 1  ;;  %v227_v24 = vadd.f32 %v226_v21, %v225_v15  ;;  %p376_p9 = pnand %p375_p8, %p369_p5 }
  0xdc   :  { %178 = vst.msk [vmem:[#allocation6] sm:$0x1] %vm163_vm3, %v177_v22 }
  0xdd   :  { %v216_v25 = vadd.f32 %v215_v23, %v214_v20  ;;  %v228_v26 = vrot.slane %v227_v24, 1 }
  0xdf   :  { %v229_v27 = vadd.f32 %v228_v26, %v227_v24  ;;  %217 = vst.msk [vmem:[#allocation4 + $0x2] sm:$0x1] %vm163_vm3, %v216_v25 }
  0xe0   :  { %379 = shalt.err (!%p376_p9)
}
  0xe1   :  { %278 = dma.vmem_to_hbm [thread:$0]  %s276_s16, 64, %s521_s5, [#allocation5]   ;;  %230 = vst.msk [vmem:[#allocation6 + $0x2] sm:$0x1] %vm163_vm3, %v229_v27 }
  0xe2   :  { %s388_s22 = scalar_lea.vmem %s286_s18, 64  ;;  %p393_p11 = scmp.lt.s32.totalorder %s286_s18, %s286_s18 }
  0xe3   :  { %p389_p10 = scmp.ne.s32.totalorder %s286_s18, %s388_s22  ;;  %p394_p12 = scmp.lt.s32.totalorder %s388_s22, %s388_s22 }
  0xe5   :  { %p395_p13 = por %p394_p12, %p393_p11 }
  0xe7   :  { %p396_p0 = pnand %p395_p13, %p389_p10 }
  0xe9   :  { %399 = shalt.err (!%p396_p0)
}
  0xea   :  { %288 = dma.vmem_to_hbm [thread:$0]  %s286_s18, 64, %s522_s6, [#allocation5]  }
  0xeb   :  { %408 = dma.done.wait [#allocation3], 256  }
  0xec   :  { %409 = vsyncadd [#allocation3], 4294967040 }
  0xed   :  { %410 = dma.done.wait [#allocation5], 128  }
  0xee   :  { %411 = vsyncadd [#allocation5], 4294967168 }
  0xef   :  { %298 = vsyncpa [#allocation3], 1 }
  0xf0   :  { %299 = vsyncpa [#allocation5], 1 }

</bundles_post_ra>
